<compile_context>
chip_gen: v5e
topology: v5e:2x2
jax: 0.10.0
libtpu: 0.0.40
codegen_flags: <defaults>
</compile_context>

<pallas_src>
import functools

import jax
import jax.numpy as jnp
from jax.experimental import pallas as pl
from jax.experimental.pallas import tpu as pltpu


def _round_up(x, m):
    return ((x + m - 1) // m) * m


def _pick_tile(dim, candidates):
    """Largest candidate that evenly divides `dim` (dim is pre-padded)."""
    for c in candidates:
        if dim % c == 0:
            return c
    return dim


def _linear_kernel(x_ref, w_ref, o_ref, acc_ref):
    # x_ref:   (tm, tk)  activation tile
    # w_ref:   (tk, tn)  pre-transposed weight tile (in, out)
    # o_ref:   (tm, tn)  output tile (resident across the K axis)
    # acc_ref: (tm, tn)  float32 accumulator scratch
    k = pl.program_id(2)

    @pl.when(k == 0)
    def _():
        acc_ref[...] = jnp.zeros_like(acc_ref)

    acc_ref[...] += jnp.dot(
        x_ref[...], w_ref[...], preferred_element_type=jnp.float32
    )

    @pl.when(k == pl.num_programs(2) - 1)
    def _():
        o_ref[...] = acc_ref[...].astype(o_ref.dtype)


def prepare_weight(weight):
    """One-time (parameter-init) repack of the module weight.

    (out_features, in_features)  ->  padded (K_pad, N_pad) = (in, out) layout,
    with K_pad/N_pad rounded up to multiples of 128 (lane-dense, MXU-friendly
    RHS).  Doing this once at init avoids a per-call HBM transpose pass.
    """
    n_out, k_in = weight.shape
    k_pad = _round_up(k_in, 128)
    n_pad = _round_up(n_out, 128)
    w_kn = weight.T  # (K, N)
    if k_pad != k_in or n_pad != n_out:
        w_kn = jnp.pad(w_kn, ((0, k_pad - k_in), (0, n_pad - n_out)))
    return w_kn


@functools.partial(jax.jit, static_argnames=("out_features",))
def replicated_linear(x, w_kn, out_features):
    """y = x @ W^T  (F.linear semantics, bias=False).

    x:     (..., in_features)
    w_kn:  pre-packed weight from `prepare_weight`, shape (K_pad, N_pad)
    returns (..., out_features), same dtype as x.
    """
    *lead, K = x.shape
    K_pad, N_pad = w_kn.shape
    N = out_features
    assert K <= K_pad and N <= N_pad

    M = 1
    for d in lead:
        M *= d
    x2d = x.reshape(M, K)

    # Pad M to a sublane multiple (or to 256-multiples for large M so we can
    # use fixed 256-row tiles); pad K to match the pre-padded weight.
    if M <= 512:
        M_pad = _round_up(max(M, 8), 8)
        tm = M_pad
    else:
        M_pad = _round_up(M, 256)
        tm = 256
    if M_pad != M or K_pad != K:
        x2d = jnp.pad(x2d, ((0, M_pad - M), (0, K_pad - K)))

    # 128-aligned tiles (full MXU utilization on v5e, fine on v6e/v7x), capped
    # so double-buffered VMEM stays well under every generation's scoped limit.
    tk = _pick_tile(K_pad, (512, 256, 128))
    tn = _pick_tile(N_pad, (512, 256, 128))

    grid = (M_pad // tm, N_pad // tn, K_pad // tk)

    itemsize = jnp.dtype(x.dtype).itemsize
    cost = pl.CostEstimate(
        flops=2 * M_pad * N_pad * K_pad,
        bytes_accessed=(M_pad * K_pad + K_pad * N_pad + M_pad * N_pad) * itemsize,
        transcendentals=0,
    )

    out2d = pl.pallas_call(
        _linear_kernel,
        out_shape=jax.ShapeDtypeStruct((M_pad, N_pad), x.dtype),
        grid_spec=pltpu.PrefetchScalarGridSpec(
            num_scalar_prefetch=0,
            grid=grid,
            in_specs=[
                pl.BlockSpec((tm, tk), lambda i, j, k: (i, k)),  # activations
                pl.BlockSpec((tk, tn), lambda i, j, k: (k, j)),  # weight tiles
            ],
            out_specs=pl.BlockSpec((tm, tn), lambda i, j, k: (i, j)),
            scratch_shapes=[pltpu.VMEM((tm, tn), jnp.float32)],
        ),
        compiler_params=pltpu.CompilerParams(
            dimension_semantics=("parallel", "parallel", "arbitrary"),
        ),
        cost_estimate=cost,
    )(x2d, w_kn)

    out2d = out2d[:M, :N]
    return out2d.reshape(*lead, N)


if __name__ == "__main__":
    # Small shapes consistent with the module: batch=2, seq=8, hidden(in)=32, out=64
    batch, seq, in_features, out_features = 2, 8, 32, 64
    init_std = 0.02

    key = jax.random.PRNGKey(0)
    k_x, k_w = jax.random.split(key)

    x = jax.random.normal(k_x, (batch, seq, in_features), dtype=jnp.float32)
    # Deterministic parameter init mirroring: torch.randn(out, in) * init_std
    weight = (
        jax.random.normal(k_w, (out_features, in_features), dtype=jnp.float32)
        * init_std
    )

    # One-time weight repack (done at "parameter init" time, not per call).
    w_kn = jax.block_until_ready(prepare_weight(weight))

    y = replicated_linear(x, w_kn, out_features)
    jax.block_until_ready(y)

    # Sanity check against plain-JAX reference (F.linear == x @ W^T)
    y_ref = jnp.einsum("bsk,nk->bsn", x, weight)
    assert y.shape == (batch, seq, out_features)
    assert jnp.allclose(y, y_ref, atol=1e-5, rtol=1e-5), "mismatch vs reference"

    print("KERNEL_OK")
</pallas_src>

<mosaic_0001>
module attributes {stable_mosaic.version = 11 : i64} {
  func.func @_linear_kernel(%arg0: i32, %arg1: i32, %arg2: i32, %arg3: memref<16x128xf32, #tpu.memory_space<vmem>>, %arg4: memref<128x128xf32, #tpu.memory_space<vmem>>, %arg5: memref<16x128xf32, #tpu.memory_space<vmem>>, %arg6: memref<16x128xf32, #tpu.memory_space<vmem>>) attributes {dimension_semantics = [#tpu.dimension_semantics<parallel>, #tpu.dimension_semantics<parallel>, #tpu.dimension_semantics<arbitrary>], iteration_bounds = array<i64: 1, 1, 1>, scalar_prefetch = 0 : i64, scratch_operands = 1 : i64, tpu.core_type = #tpu.core_type<tc>, window_params = [{transform_indices = @transform_0, window_bounds = array<i64: 16, 128>}, {transform_indices = @transform_1, window_bounds = array<i64: 128, 128>}, {transform_indices = @transform_2, window_bounds = array<i64: 16, 128>}]} {
    %c0_i32 = arith.constant 0 : i32
    %0 = arith.cmpi eq, %arg2, %c0_i32 : i32
    %1 = arith.extui %0 : i1 to i32
    %c0_i32_0 = arith.constant 0 : i32
    %2 = arith.cmpi ne, %1, %c0_i32_0 : i32
    scf.if %2 {
      %cst_10 = arith.constant 0.000000e+00 : f32
      %12 = vector.broadcast %cst_10 : f32 to vector<16x128xf32>
      %c0_11 = arith.constant 0 : index
      %c0_12 = arith.constant 0 : index
      %13 = vector.load %arg6[%c0_11, %c0_12] : memref<16x128xf32, #tpu.memory_space<vmem>>, vector<16x128xf32>
      tpu.vector_store %arg6[%c0_11, %c0_12], %12 {strides = array<i32>} : memref<16x128xf32, #tpu.memory_space<vmem>>, vector<16x128xf32>,
    } else {
    }
    %c0 = arith.constant 0 : index
    %c0_1 = arith.constant 0 : index
    %3 = vector.load %arg6[%c0, %c0_1] : memref<16x128xf32, #tpu.memory_space<vmem>>, vector<16x128xf32>
    %c0_2 = arith.constant 0 : index
    %c0_3 = arith.constant 0 : index
    %4 = vector.load %arg3[%c0_2, %c0_3] : memref<16x128xf32, #tpu.memory_space<vmem>>, vector<16x128xf32>
    %c0_4 = arith.constant 0 : index
    %c0_5 = arith.constant 0 : index
    %5 = vector.load %arg4[%c0_4, %c0_5] : memref<128x128xf32, #tpu.memory_space<vmem>>, vector<128x128xf32>
    %cst = arith.constant dense<0.000000e+00> : vector<16x128xf32>
    %6 = tpu.matmul %4, %5, %cst {dimension_numbers = #tpu.dot_dimension_numbers<[1], [0], [0], [1], [0, 0, 1, 1], [], []>} : vector<16x128xf32>, vector<128x128xf32>, vector<16x128xf32> -> vector<16x128xf32>
    %7 = arith.addf %3, %6 : vector<16x128xf32>
    %c0_6 = arith.constant 0 : index
    %c0_7 = arith.constant 0 : index
    %8 = vector.load %arg6[%c0_6, %c0_7] : memref<16x128xf32, #tpu.memory_space<vmem>>, vector<16x128xf32>
    tpu.vector_store %arg6[%c0_6, %c0_7], %7 {strides = array<i32>} : memref<16x128xf32, #tpu.memory_space<vmem>>, vector<16x128xf32>,
    %c0_i32_8 = arith.constant 0 : i32
    %9 = arith.cmpi eq, %arg2, %c0_i32_8 : i32
    %10 = arith.extui %9 : i1 to i32
    %c0_i32_9 = arith.constant 0 : i32
    %11 = arith.cmpi ne, %10, %c0_i32_9 : i32
    scf.if %11 {
      %c0_10 = arith.constant 0 : index
      %c0_11 = arith.constant 0 : index
      %12 = vector.load %arg6[%c0_10, %c0_11] : memref<16x128xf32, #tpu.memory_space<vmem>>, vector<16x128xf32>
      %c0_12 = arith.constant 0 : index
      %c0_13 = arith.constant 0 : index
      %13 = vector.load %arg5[%c0_12, %c0_13] : memref<16x128xf32, #tpu.memory_space<vmem>>, vector<16x128xf32>
      tpu.vector_store %arg5[%c0_12, %c0_13], %12 {strides = array<i32>} : memref<16x128xf32, #tpu.memory_space<vmem>>, vector<16x128xf32>,
    } else {
    }
    return
  }
  func.func @transform_0(%arg0: i32, %arg1: i32, %arg2: i32) -> (i32, i32) {
    %c0_i32 = arith.constant 0 : i32
    return %arg0, %arg2 : i32, i32
  }
  func.func @transform_1(%arg0: i32, %arg1: i32, %arg2: i32) -> (i32, i32) {
    %c0_i32 = arith.constant 0 : i32
    return %arg2, %arg1 : i32, i32
  }
  func.func @transform_2(%arg0: i32, %arg1: i32, %arg2: i32) -> (i32, i32) {
    %c0_i32 = arith.constant 0 : i32
    return %arg0, %arg1 : i32, i32
  }
}

</mosaic_0001>

<bundles_post_ra>
// kernel: replicated_linear.1
= control target key start
LH: loop header
LB: loop body
LE: loop exit
PB: predicated region body
PF: predicated region fallthrough
CT: control target
= control target key end

     0   :  { %7 = vsyncpa [#allocation4], 0  ;;  %s137_s12 = smov [#allocation3]   ;;  %s138_s14 = smov 128   ;;  %s170_s0 = inlined_call_operand.vmem [shape: f32[16,128], index: 0, kind: input, shape index: {}]   ;;  %s171_s1 = inlined_call_operand.hbm [shape: f32[128,128], index: 1, kind: input, shape index: {}]   ;;  %s172_s2 = inlined_call_operand.vmem [shape: f32[16,128], index: 2, kind: output, shape index: {}]  }
   0x1   :  { %s14_s11 = sshll.u32 %s171_s1, 4  ;;  %s16_s13 = sshll.u32 %s137_s12, 4  ;;  %s15_s11 = int_to_ptr.hbm [resolvable:$true] %s14_s11  ;;  %s17_s13 = int_to_ptr.vmem [resolvable:$true] %s16_s13 }
   0x2   :  { %s139_s15 = smov 8  }
   0x3   :  { %22 = dma.hbm_to_vmem [thread:$0]  %s15_s11, 2048, %s17_s13, [#allocation4], %s138_s14, %s138_s14, %s139_s15  }
   0x4   :  { %135 = dma.done.wait [#allocation4], 2048  }
   0x5   :  { %136 = vsyncadd [#allocation4], 4294965248  ;;  %v52_v0 = vld [vmem:[#allocation3 + $0x78] sm:$0xff]  ;;  %v51_v1 = vld [vmem:[#allocation3 + $0x70] sm:$0xff] }
   0x6   :  { %53 = vmatpush.msra.mxu0 %v52_v0  ;;  %92 = vmatpush.msra.mxu1 %v52_v0  ;;  %v50_v2 = vld [vmem:[#allocation3 + $0x68] sm:$0xff]  ;;  %v49_v3 = vld [vmem:[#allocation3 + $0x60] sm:$0xff]  ;;  %v48_v4 = vld [vmem:[#allocation3 + $0x58] sm:$0xff] }
   0x7   :  { %v47_v5 = vld [vmem:[#allocation3 + $0x50] sm:$0xff]  ;;  %v46_v6 = vld [vmem:[#allocation3 + $0x48] sm:$0xff]  ;;  %v45_v7 = vld [vmem:[#allocation3 + $0x40] sm:$0xff] }
   0x8   :  { %54 = vmatpush.msra.mxu0 %v51_v1  ;;  %93 = vmatpush.msra.mxu1 %v51_v1  ;;  %v44_v8 = vld [vmem:[#allocation3 + $0x38] sm:$0xff]  ;;  %v43_v9 = vld [vmem:[#allocation3 + $0x30] sm:$0xff]  ;;  %v42_v10 = vld [vmem:[#allocation3 + $0x28] sm:$0xff] }
   0x9   :  { %v41_v11 = vld [vmem:[#allocation3 + $0x20] sm:$0xff]  ;;  %v40_v12 = vld [vmem:[#allocation3 + $0x18] sm:$0xff]  ;;  %v39_v13 = vld [vmem:[#allocation3 + $0x10] sm:$0xff] }
   0xa   :  { %55 = vmatpush.msra.mxu0 %v50_v2  ;;  %94 = vmatpush.msra.mxu1 %v50_v2  ;;  %v38_v14 = vld [vmem:[#allocation3 + $0x8] sm:$0xff]  ;;  %v37_v15 = vld [vmem:[#allocation3] sm:$0xff] }
   0xb   :  { %v35_v16 = vld [vmem:[%s170_s0] sm:$0xff]  ;;  %v36_v17 = vld [vmem:[%s170_s0 + $0x8] sm:$0xff] }
   0xc   :  { %56 = vmatpush.msra.mxu0 %v49_v3  ;;  %95 = vmatpush.msra.mxu1 %v49_v3 }
   0xe   :  { %57 = vmatpush.msra.mxu0 %v48_v4  ;;  %96 = vmatpush.msra.mxu1 %v48_v4 }
  0x10   :  { %58 = vmatpush.msra.mxu0 %v47_v5  ;;  %97 = vmatpush.msra.mxu1 %v47_v5 }
  0x12   :  { %59 = vmatpush.msra.mxu0 %v46_v6  ;;  %98 = vmatpush.msra.mxu1 %v46_v6 }
  0x14   :  { %60 = vmatpush.msra.mxu0 %v45_v7  ;;  %99 = vmatpush.msra.mxu1 %v45_v7 }
  0x16   :  { %61 = vmatpush.msra.mxu0 %v44_v8  ;;  %100 = vmatpush.msra.mxu1 %v44_v8 }
  0x18   :  { %62 = vmatpush.msra.mxu0 %v43_v9  ;;  %101 = vmatpush.msra.mxu1 %v43_v9 }
  0x1a   :  { %63 = vmatpush.msra.mxu0 %v42_v10  ;;  %102 = vmatpush.msra.mxu1 %v42_v10 }
  0x1c   :  { %64 = vmatpush.msra.mxu0 %v41_v11  ;;  %103 = vmatpush.msra.mxu1 %v41_v11 }
  0x1e   :  { %65 = vmatpush.msra.mxu0 %v40_v12  ;;  %104 = vmatpush.msra.mxu1 %v40_v12 }
  0x20   :  { %66 = vmatpush.msra.mxu0 %v39_v13  ;;  %105 = vmatpush.msra.mxu1 %v39_v13 }
  0x22   :  { %67 = vmatpush.msra.mxu0 %v38_v14  ;;  %106 = vmatpush.msra.mxu1 %v38_v14 }
  0x24   :  { %68 = vmatpush.msra.mxu0 %v37_v15  ;;  %107 = vmatpush.msra.mxu1 %v37_v15 }
  0x25   :  { %69 = vmatmul.f32.vlgmr.msra.gmra.mxu0 %v35_v16  ;;  %72 = vmatmul.f32.vlgmr.msra.gmra.mxu1 %v36_v17 }
  0xa2   :  { %v70_v18 = vpop.f32.mrf.mxu0  ;;  %v73_v19 = vpop.f32.mrf.mxu1 }
  0xa3   :  { %85 = vst [vmem:[%s172_s2] sm:$0xff] %v70_v18 }
  0xa4   :  { %86 = vst [vmem:[%s172_s2 + $0x8] sm:$0xff] %v73_v19 }
  0xa5   :  { %91 = vsyncpa [#allocation4], 1 }

</bundles_post_ra>
